<compile_context>
chip_gen: v7x
topology: tpu7x:2x2x1
jax: 0.10.0
libtpu: 0.0.40
codegen_flags: <defaults>
</compile_context>

<pallas_src>
import jax
import jax.numpy as jnp
from jax.experimental import pallas as pl
from jax.experimental.pallas import tpu as pltpu

dim_input = 6
dim_hidden = 8
dim_output = 3

PAD = 128  # lane width — keeps every last dim dense on the 128-lane axis


def controller_kernel(x_ref, w1_ref, w2_ref, o_ref):
    # Layer 1: Linear(dim_input, dim_hidden) + Tanh.
    # x_ref already carries a 1.0 in column `dim_input`, and w1_ref carries b1
    # in row `dim_input`, so the bias add is folded into the matmul.
    x = x_ref[...]
    h = jnp.tanh(jnp.dot(x, w1_ref[...], preferred_element_type=jnp.float32))

    # Padded hidden lanes are tanh(0) = 0; overwrite slot `dim_hidden` with 1
    # so row `dim_hidden` of w2_ref (which holds b2) acts as the bias.
    col = jax.lax.broadcasted_iota(jnp.int32, h.shape, 1)
    h = jnp.where(col == dim_hidden, jnp.float32(1.0), h)

    # Layer 2: Linear(dim_hidden, dim_output) + Sigmoid (bias folded as above).
    y = jnp.dot(h, w2_ref[...], preferred_element_type=jnp.float32)
    o_ref[...] = jax.nn.sigmoid(y)


def pack_params(w1, b1, w2, b2):
    """Fold biases into lane-padded weight matrices (done once, offline)."""
    w1_aug = jnp.zeros((PAD, PAD), jnp.float32)
    w1_aug = w1_aug.at[:dim_input, :dim_hidden].set(w1)
    w1_aug = w1_aug.at[dim_input, :dim_hidden].set(b1.reshape(-1))

    w2_aug = jnp.zeros((PAD, PAD), jnp.float32)
    w2_aug = w2_aug.at[:dim_hidden, :dim_output].set(w2)
    w2_aug = w2_aug.at[dim_hidden, :dim_output].set(b2.reshape(-1))
    return w1_aug, w2_aug


@jax.jit
def controller_forward(state, w1_aug, w2_aug):
    """state: (B, dim_input) f32 -> action: (B, dim_output) f32."""
    B = state.shape[0]
    # Lane-pad the input and set the constant-1 bias column.
    x_aug = jnp.zeros((B, PAD), jnp.float32)
    x_aug = x_aug.at[:, :dim_input].set(state.astype(jnp.float32))
    x_aug = x_aug.at[:, dim_input].set(1.0)

    vmem = pl.BlockSpec(memory_space=pltpu.MemorySpace.VMEM)
    out = pl.pallas_call(
        controller_kernel,
        out_shape=jax.ShapeDtypeStruct((B, PAD), jnp.float32),
        in_specs=[vmem, vmem, vmem],
        out_specs=vmem,
    )(x_aug, w1_aug, w2_aug)
    return out[:, :dim_output]


def init_params(key):
    """Deterministic init matching nn.Linear's U(-1/sqrt(fan_in), 1/sqrt(fan_in))."""
    k1, k2, k3, k4 = jax.random.split(key, 4)
    bound1 = 1.0 / jnp.sqrt(jnp.float32(dim_input))
    bound2 = 1.0 / jnp.sqrt(jnp.float32(dim_hidden))
    w1 = jax.random.uniform(k1, (dim_input, dim_hidden), jnp.float32, -bound1, bound1)
    b1 = jax.random.uniform(k2, (1, dim_hidden), jnp.float32, -bound1, bound1)
    w2 = jax.random.uniform(k3, (dim_hidden, dim_output), jnp.float32, -bound2, bound2)
    b2 = jax.random.uniform(k4, (1, dim_output), jnp.float32, -bound2, bound2)
    return w1, b1, w2, b2


if __name__ == "__main__":
    key = jax.random.PRNGKey(0)
    k_param, k_state = jax.random.split(key)
    w1, b1, w2, b2 = init_params(k_param)
    w1_aug, w2_aug = pack_params(w1, b1, w2, b2)

    batch = 8  # one sublane group; many envs/timesteps should be batched here
    state = jax.random.normal(k_state, (batch, dim_input), jnp.float32)

    action = controller_forward(state, w1_aug, w2_aug)
    action = jax.block_until_ready(action)

    # Reference check in plain JAX against the original (unpadded) parameters.
    ref = jax.nn.sigmoid(jnp.tanh(state @ w1 + b1) @ w2 + b2)
    assert action.shape == (batch, dim_output)
    assert jnp.allclose(action, ref, atol=1e-5, rtol=1e-5)

    print("KERNEL_OK")
</pallas_src>

<mosaic_0001>
module attributes {stable_mosaic.version = 11 : i64} {
  func.func @controller_kernel(%arg0: memref<8x128xf32, #tpu.memory_space<vmem>>, %arg1: memref<128x128xf32, #tpu.memory_space<vmem>>, %arg2: memref<128x128xf32, #tpu.memory_space<vmem>>, %arg3: memref<8x128xf32, #tpu.memory_space<vmem>>) attributes {dimension_semantics = [], scalar_prefetch = 0 : i64, scratch_operands = 0 : i64, tpu.core_type = #tpu.core_type<tc>} {
    %c0 = arith.constant 0 : index
    %c0_0 = arith.constant 0 : index
    %0 = vector.load %arg0[%c0, %c0_0] : memref<8x128xf32, #tpu.memory_space<vmem>>, vector<8x128xf32>
    %c0_1 = arith.constant 0 : index
    %c0_2 = arith.constant 0 : index
    %1 = vector.load %arg1[%c0_1, %c0_2] : memref<128x128xf32, #tpu.memory_space<vmem>>, vector<128x128xf32>
    %cst = arith.constant dense<0.000000e+00> : vector<8x128xf32>
    %2 = tpu.matmul %0, %1, %cst {dimension_numbers = #tpu.dot_dimension_numbers<[1], [0], [0], [1], [0, 0, 1, 1], [], []>} : vector<8x128xf32>, vector<128x128xf32>, vector<8x128xf32> -> vector<8x128xf32>
    %3 = math.tanh %2 : vector<8x128xf32>
    %4 = tpu.iota {dimensions = array<i32: 1>} : vector<8x128xi32>
    %c8_i32 = arith.constant 8 : i32
    %5 = vector.broadcast %c8_i32 : i32 to vector<8x128xi32>
    %6 = arith.cmpi eq, %4, %5 : vector<8x128xi32>
    %cst_3 = arith.constant 1.000000e+00 : f32
    %7 = vector.broadcast %cst_3 : f32 to vector<8x128xf32>
    %8 = arith.select %6, %7, %3 : vector<8x128xi1>, vector<8x128xf32>
    %c0_4 = arith.constant 0 : index
    %c0_5 = arith.constant 0 : index
    %9 = vector.load %arg2[%c0_4, %c0_5] : memref<128x128xf32, #tpu.memory_space<vmem>>, vector<128x128xf32>
    %cst_6 = arith.constant dense<0.000000e+00> : vector<8x128xf32>
    %10 = tpu.matmul %8, %9, %cst_6 {dimension_numbers = #tpu.dot_dimension_numbers<[1], [0], [0], [1], [0, 0, 1, 1], [], []>} : vector<8x128xf32>, vector<128x128xf32>, vector<8x128xf32> -> vector<8x128xf32>
    %11 = arith.negf %10 : vector<8x128xf32>
    %12 = math.exp %11 : vector<8x128xf32>
    %cst_7 = arith.constant 1.000000e+00 : f32
    %13 = vector.broadcast %cst_7 : f32 to vector<8x128xf32>
    %14 = arith.addf %13, %12 : vector<8x128xf32>
    %15 = arith.divf %13, %14 : vector<8x128xf32>
    %c0_8 = arith.constant 0 : index
    %c0_9 = arith.constant 0 : index
    %16 = vector.load %arg3[%c0_8, %c0_9] : memref<8x128xf32, #tpu.memory_space<vmem>>, vector<8x128xf32>
    tpu.vector_store %arg3[%c0_8, %c0_9], %15 {strides = array<i32>} : memref<8x128xf32, #tpu.memory_space<vmem>>, vector<8x128xf32>,
    return
  }
}

</mosaic_0001>

<bundles_post_ra>
// kernel: controller_forward.1
= control target key start
LH: loop header
LB: loop body
LE: loop exit
PB: predicated region body
PF: predicated region fallthrough
CT: control target
= control target key end

     0   :  { %8 = vsyncpa [#allocation3], 0  ;;  %s520_s0 = inlined_call_operand.vmem [shape: f32[8,128], index: 0, kind: input, shape index: {}]   ;;  %s521_s1 = inlined_call_operand.hbm [shape: f32[128,128], index: 1, kind: input, shape index: {}]   ;;  %s522_s2 = inlined_call_operand.hbm [shape: f32[128,128], index: 2, kind: input, shape index: {}]   ;;  %s523_s3 = inlined_call_operand.vmem [shape: f32[8,128], index: 3, kind: output, shape index: {}]  }
   0x1   :  { %9 = vsyncpa [#allocation5], 0  ;;  %s447_s12 = smov [#allocation2]   ;;  %s399_s16 = scalar_lea.hbm %s521_s1, 2048 }
   0x2   :  { %s17_s13 = sshll.u32 %s447_s12, 4  ;;  %p400_p0 = scmp.ne.s32.totalorder %s521_s1, %s399_s16  ;;  %s18_s13 = int_to_ptr.vmem [resolvable:$true] %s17_s13 }
   0x3   :  { %p403_p1 = scmp.lt.u32.totalorder %s399_s16, %s521_s1 }
   0x5   :  { %p405_p2 = pnand %p403_p1, %p400_p0 }
   0x7   :  { %408 = shalt.err (!%p405_p2)
}
   0x8   :  { %s409_s21 = scalar_lea.vmem %s18_s13, 2048  ;;  %p414_p4 = scmp.lt.s32.totalorder %s18_s13, %s18_s13 }
   0x9   :  { %p410_p3 = scmp.ne.s32.totalorder %s18_s13, %s409_s21  ;;  %p415_p5 = scmp.lt.s32.totalorder %s409_s21, %s409_s21 }
   0xb   :  { %p416_p6 = por %p415_p5, %p414_p4 }
   0xd   :  { %p417_p7 = pnand %p416_p6, %p410_p3 }
   0xf   :  { %420 = shalt.err (!%p417_p7)
}
  0x10   :  { %s448_s22 = smov 128   ;;  %s449_s23 = smov 8  }
  0x11   :  { %23 = dma.hbm_to_vmem [thread:$0]  %s521_s1, 2048, %s18_s13, [#allocation3], %s448_s22, %s448_s22, %s449_s23  }
  0x12   :  { %s450_s26 = smov [#allocation4]   ;;  %s421_s30 = scalar_lea.hbm %s522_s2, 2048 }
  0x13   :  { %s29_s27 = sshll.u32 %s450_s26, 4  ;;  %p422_p8 = scmp.ne.s32.totalorder %s522_s2, %s421_s30  ;;  %s30_s27 = int_to_ptr.vmem [resolvable:$true] %s29_s27 }
  0x14   :  { %p425_p9 = scmp.lt.u32.totalorder %s421_s30, %s522_s2 }
  0x16   :  { %p427_p10 = pnand %p425_p9, %p422_p8 }
  0x18   :  { %430 = shalt.err (!%p427_p10)
}
  0x19   :  { %s431_s8 = scalar_lea.vmem %s30_s27, 2048  ;;  %p436_p12 = scmp.lt.s32.totalorder %s30_s27, %s30_s27 }
  0x1a   :  { %p432_p11 = scmp.ne.s32.totalorder %s30_s27, %s431_s8  ;;  %p437_p13 = scmp.lt.s32.totalorder %s431_s8, %s431_s8 }
  0x1c   :  { %p438_p0 = por %p437_p13, %p436_p12 }
  0x1e   :  { %p439_p1 = pnand %p438_p0, %p432_p11 }
  0x20   :  { %442 = shalt.err (!%p439_p1)
}
  0x21   :  { %35 = dma.hbm_to_vmem [thread:$0]  %s522_s2, 2048, %s30_s27, [#allocation5], %s448_s22, %s448_s22, %s449_s23  }
  0x22   :  { %443 = dma.done.wait [#allocation3], 2048  }
  0x23   :  { %444 = vsyncadd [#allocation3], 4294965248 }
  0x24   :  { %445 = dma.done.wait [#allocation5], 2048  }
  0x25   :  { %446 = vsyncadd [#allocation5], 4294965248  ;;  %v451_v0 = vmov 0.0|0.0   ;;  %vm452_vm0 = vmmov 0   ;;  %v453_v1 = vmov 0.0   ;;  %v43_v2 = vld [vmem:[#allocation2] sm:$0xff]  ;;  %v130_v53 = vlaneseq }
  0x26   :  { %338 = vmatprep.subr.bf16.mxu0 %v451_v0  ;;  %300 = vmatprep.mubr.msk.f32.mxu0 %vm452_vm0, %v453_v1  ;;  %v44_v3 = vld [vmem:[#allocation2 + $0x8] sm:$0xff]  ;;  %v45_v4 = vld [vmem:[#allocation2 + $0x10] sm:$0xff]  ;;  %v46_v6 = vld [vmem:[#allocation2 + $0x18] sm:$0xff] }
  0x27   :  { %362 = vmatprep.subr.bf16.mxu1 %v451_v0  ;;  %335 = vmatprep.mubr.msk.f32.mxu1 %vm452_vm0, %v453_v1  ;;  %v339_v5 = vpack.c.bf16 %v44_v3, %v43_v2  ;;  %v342_v7 = vpack.c.bf16 %v46_v6, %v45_v4  ;;  %v47_v8 = vld [vmem:[#allocation2 + $0x20] sm:$0xff]  ;;  %v48_v9 = vld [vmem:[#allocation2 + $0x28] sm:$0xff]  ;;  %v136_v12 = vld [vmem:[#allocation4 + $0x10] sm:$0xff]  ;;  %v131_v54 = vand.u32 127, %v130_v53 }
  0x28   :  { %v134_v10 = vld [vmem:[#allocation4] sm:$0xff]  ;;  %v135_v11 = vld [vmem:[#allocation4 + $0x8] sm:$0xff]  ;;  %v137_v13 = vld [vmem:[#allocation4 + $0x18] sm:$0xff]  ;;  %v345_v14 = vpack.c.bf16 %v48_v9, %v47_v8 }
  0x29   :  { %340 = vmatpush3.bf16.msra.mxu0 %v339_v5  ;;  %v363_v15 = vpack.c.bf16 %v135_v11, %v134_v10  ;;  %v49_v16 = vld [vmem:[#allocation2 + $0x30] sm:$0xff]  ;;  %v50_v17 = vld [vmem:[#allocation2 + $0x38] sm:$0xff]  ;;  %v366_v18 = vpack.c.bf16 %v137_v13, %v136_v12  ;;  %v138_v19 = vld [vmem:[#allocation4 + $0x20] sm:$0xff]  ;;  %vm132_vm1 = vcmp.eq.s32.totalorder %v131_v54, 8 }
  0x2a   :  { %341 = vmatprep.subr.bf16.mxu0 %v451_v0  ;;  %v139_v20 = vld [vmem:[#allocation4 + $0x28] sm:$0xff]  ;;  %v348_v21 = vpack.c.bf16 %v50_v17, %v49_v16  ;;  %v51_v22 = vld [vmem:[#allocation2 + $0x40] sm:$0xff]  ;;  %v140_v25 = vld [vmem:[#allocation4 + $0x30] sm:$0xff] }
  0x2b   :  { %364 = vmatpush3.bf16.msra.mxu1 %v363_v15  ;;  %v52_v23 = vld [vmem:[#allocation2 + $0x48] sm:$0xff]  ;;  %v369_v24 = vpack.c.bf16 %v139_v20, %v138_v19  ;;  %v141_v26 = vld [vmem:[#allocation4 + $0x38] sm:$0xff]  ;;  %v53_v28 = vld [vmem:[#allocation2 + $0x50] sm:$0xff] }
  0x2c   :  { %365 = vmatprep.subr.bf16.mxu1 %v451_v0  ;;  %v351_v27 = vpack.c.bf16 %v52_v23, %v51_v22  ;;  %v54_v29 = vld [vmem:[#allocation2 + $0x58] sm:$0xff]  ;;  %v372_v30 = vpack.c.bf16 %v141_v26, %v140_v25  ;;  %v142_v31 = vld [vmem:[#allocation4 + $0x40] sm:$0xff]  ;;  %v143_v32 = vld [vmem:[#allocation4 + $0x48] sm:$0xff] }
  0x2d   :  { %343 = vmatpush3.bf16.msra.mxu0 %v342_v7  ;;  %v354_v33 = vpack.c.bf16 %v54_v29, %v53_v28  ;;  %v55_v34 = vld [vmem:[#allocation2 + $0x60] sm:$0xff]  ;;  %v56_v35 = vld [vmem:[#allocation2 + $0x68] sm:$0xff]  ;;  %v375_v36 = vpack.c.bf16 %v143_v32, %v142_v31  ;;  %v57_v38 = vld [vmem:[#allocation2 + $0x70] sm:$0xff] }
  0x2e   :  { %344 = vmatprep.subr.bf16.mxu0 %v451_v0  ;;  %v357_v37 = vpack.c.bf16 %v56_v35, %v55_v34  ;;  %v58_v39 = vld [vmem:[#allocation2 + $0x78] sm:$0xff]  ;;  %v42_v41 = vld [vmem:[%s520_s0] sm:$0xff]  ;;  %v144_v42 = vld [vmem:[#allocation4 + $0x50] sm:$0xff] }
  0x2f   :  { %367 = vmatpush3.bf16.msra.mxu1 %v366_v18  ;;  %v360_v40 = vpack.c.bf16 %v58_v39, %v57_v38  ;;  %v145_v43 = vld [vmem:[#allocation4 + $0x58] sm:$0xff]  ;;  %v146_v45 = vld [vmem:[#allocation4 + $0x60] sm:$0xff]  ;;  %v147_v46 = vld [vmem:[#allocation4 + $0x68] sm:$0xff] }
  0x30   :  { %368 = vmatprep.subr.bf16.mxu1 %v451_v0  ;;  %v378_v44 = vpack.c.bf16 %v145_v43, %v144_v42  ;;  %v381_v47 = vpack.c.bf16 %v147_v46, %v146_v45  ;;  %v148_v48 = vld [vmem:[#allocation4 + $0x70] sm:$0xff]  ;;  %v149_v49 = vld [vmem:[#allocation4 + $0x78] sm:$0xff] }
  0x31   :  { %346 = vmatpush3.bf16.msra.mxu0 %v345_v14  ;;  %v384_v50 = vpack.c.bf16 %v149_v49, %v148_v48 }
  0x32   :  { %347 = vmatprep.subr.bf16.mxu0 %v451_v0 }
  0x33   :  { %370 = vmatpush3.bf16.msra.mxu1 %v369_v24 }
  0x34   :  { %371 = vmatprep.subr.bf16.mxu1 %v451_v0 }
  0x35   :  { %349 = vmatpush3.bf16.msra.mxu0 %v348_v21 }
  0x36   :  { %350 = vmatprep.subr.bf16.mxu0 %v451_v0 }
  0x37   :  { %373 = vmatpush3.bf16.msra.mxu1 %v372_v30 }
  0x38   :  { %374 = vmatprep.subr.bf16.mxu1 %v451_v0 }
  0x39   :  { %352 = vmatpush3.bf16.msra.mxu0 %v351_v27 }
  0x3a   :  { %353 = vmatprep.subr.bf16.mxu0 %v451_v0 }
  0x3b   :  { %376 = vmatpush3.bf16.msra.mxu1 %v375_v36 }
  0x3c   :  { %377 = vmatprep.subr.bf16.mxu1 %v451_v0 }
  0x3d   :  { %355 = vmatpush3.bf16.msra.mxu0 %v354_v33 }
  0x3e   :  { %356 = vmatprep.subr.bf16.mxu0 %v451_v0 }
  0x3f   :  { %379 = vmatpush3.bf16.msra.mxu1 %v378_v44 }
  0x40   :  { %380 = vmatprep.subr.bf16.mxu1 %v451_v0 }
  0x41   :  { %358 = vmatpush3.bf16.msra.mxu0 %v357_v37 }
  0x42   :  { %359 = vmatprep.subr.bf16.mxu0 %v451_v0 }
  0x43   :  { %382 = vmatpush3.bf16.msra.mxu1 %v381_v47 }
  0x44   :  { %383 = vmatprep.subr.bf16.mxu1 %v451_v0 }
  0x45   :  { %361 = vmatpush3.bf16.msra.mxu0 %v360_v40 }
  0x47   :  { %385 = vmatpush3.bf16.msra.mxu1 %v384_v50 }
  0x48   :  { %301 = vmatmul.mubr.f32.vlgmr.msra.gmra.mrb[0].mxu0 %v42_v41 }
 0x11b   :  { %v125_v51 = vpop.f32.mrb[0].mxu0 }
 0x11c   :  { %393 = vtanh.f32 %v125_v51  ;;  %v302_v52 = vpop.f32.mrb[1].mxu0 }
 0x126   :  { %v394_v55 = vpop.eup %393 }
 0x127   :  { %v133_v56 = vsel %vm132_vm1, 1.0, %v394_v55 }
 0x128   :  { %336 = vmatmul.mubr.f32.vlgmr.msra.gmra.mrb[0].mxu1 %v133_v56 }
 0x1fb   :  { %v216_v57 = vpop.f32.mrb[0].mxu1 }
 0x1fc   :  { %v233_v58 = vmul.f32 -1.442695, %v216_v57  ;;  %v337_v59 = vpop.f32.mrb[1].mxu1 }
 0x1fe   :  { %395 = vpow2.f32 %v233_v58 }
 0x208   :  { %v396_v60 = vpop.eup %395 }
 0x209   :  { %v223_v61 = vadd.f32 1.0, %v396_v60 }
 0x20b   :  { %397 = vrcp.f32 %v223_v61 }
 0x215   :  { %v398_v62 = vpop.eup %397 }
 0x216   :  { %226 = vst [vmem:[%s523_s3] sm:$0xff] %v398_v62 }
 0x217   :  { %231 = vsyncpa [#allocation3], 1 }
 0x218   :  { %232 = vsyncpa [#allocation5], 1 }

</bundles_post_ra>
